<compile_context>
chip_gen: v7x
topology: tpu7x:2x2x1
jax: 0.10.0
libtpu: 0.0.40
codegen_flags: <defaults>
</compile_context>

<pallas_src>
import functools

import jax
import jax.numpy as jnp
from jax.experimental import pallas as pl
from jax.experimental.pallas import tpu as pltpu


INPUT_DIM = 2
OUTPUT_DIM = 2
HIDDEN = 32              # hidden_layers=[32, 32]
LN_EPS = 1e-5            # PyTorch nn.LayerNorm default eps
BATCH_TILE_MAX = 8192    # rows per grid step (multiple of 128); keeps VMEM modest


def _round_up(n, m):
    return ((n + m - 1) // m) * m


def _layernorm_cols(h, gamma, beta):
    """LayerNorm over the feature (sublane) axis 0; h: (F, TB), gamma/beta: (F, 1)."""
    mu = jnp.mean(h, axis=0, keepdims=True)
    d = h - mu
    var = jnp.mean(d * d, axis=0, keepdims=True)           # biased variance (PyTorch)
    return d * jax.lax.rsqrt(var + LN_EPS) * gamma + beta


def policy_kernel(p1_ref, w2_ref, p3_ref, x_ref, logp_ref):
    # p1: (32, 8)  cols: [w1[:,0], w1[:,1], b1, ln1_gamma, ln1_beta, 0, 0, 0]
    # w2: (32, 32) PyTorch (out, in) layout -> h2 = W2 @ h1 directly
    # p3: (32, 8)  cols: [b2, ln2_gamma, ln2_beta, w3[0,:], w3[1,:], b3(rows 0:2), 0, 0]
    # x : (INPUT_DIM, TB)  batch on lanes
    x = x_ref[...]
    p1 = p1_ref[...]
    p3 = p3_ref[...]

    # ---- Layer 1: Linear(2, 32) as VPU broadcast FMAs (K=2 would waste the MXU) ----
    h = p1[:, 0:1] * x[0:1, :] + p1[:, 1:2] * x[1:2, :] + p1[:, 2:3]   # (32, TB)
    h = jnp.maximum(h, 0.0)
    h = _layernorm_cols(h, p1[:, 3:4], p1[:, 4:5])

    # ---- Layer 2: Linear(32, 32) on the MXU: (32,32) @ (32,TB) ----
    h = jnp.dot(w2_ref[...], h, preferred_element_type=jnp.float32) + p3[:, 0:1]
    h = jnp.maximum(h, 0.0)
    h = _layernorm_cols(h, p3[:, 1:2], p3[:, 2:3])

    # ---- Output layer: Linear(32, 2) as sublane reductions (N=2 would waste the MXU) ----
    l0 = jnp.sum(p3[:, 3:4] * h, axis=0, keepdims=True) + p3[0:1, 5:6]  # (1, TB)
    l1 = jnp.sum(p3[:, 4:5] * h, axis=0, keepdims=True) + p3[1:2, 5:6]  # (1, TB)
    logits = jnp.concatenate([l0, l1], axis=0)                          # (2, TB)

    # ---- log-softmax over the 2 classes (Categorical(logits=X).logits) ----
    m = jnp.max(logits, axis=0, keepdims=True)
    lse = m + jnp.log(jnp.sum(jnp.exp(logits - m), axis=0, keepdims=True))
    logp_ref[...] = logits - lse                                        # single full store


def _pack_params(params):
    """Pack the 10 PyTorch-layout tensors into 3 kernel arrays."""
    w1, b1, g1, be1, w2, b2, g2, be2, w3, b3 = params
    p1 = jnp.zeros((HIDDEN, 8), jnp.float32)
    p1 = p1.at[:, 0:2].set(w1)        # w1: (32, 2)  (out, in)
    p1 = p1.at[:, 2].set(b1)
    p1 = p1.at[:, 3].set(g1)
    p1 = p1.at[:, 4].set(be1)

    p3 = jnp.zeros((HIDDEN, 8), jnp.float32)
    p3 = p3.at[:, 0].set(b2)
    p3 = p3.at[:, 1].set(g2)
    p3 = p3.at[:, 2].set(be2)
    p3 = p3.at[:, 3:5].set(w3.T)      # (32, 2)
    p3 = p3.at[0:OUTPUT_DIM, 5].set(b3)
    return p1, w2, p3


@functools.partial(jax.jit, static_argnames=())
def categorical_policy_forward(x, params):
    """x: (B, INPUT_DIM) float32, params in PyTorch layouts.

    Returns the normalized log-probs (B, OUTPUT_DIM), i.e. exactly what
    torch.distributions.Categorical(logits=X).logits holds.
    """
    B = x.shape[0]
    TB = min(BATCH_TILE_MAX, _round_up(max(B, 1), 128))
    B_pad = _round_up(B, TB)

    # Batch-on-lanes layout, zero-padded to a multiple of the batch tile.
    xt = jnp.zeros((INPUT_DIM, B_pad), jnp.float32).at[:, :B].set(x.T)
    p1, w2, p3 = _pack_params(params)

    grid = (B_pad // TB,)
    logp_t = pl.pallas_call(
        policy_kernel,
        grid=grid,
        in_specs=[
            pl.BlockSpec((HIDDEN, 8), lambda i: (0, 0)),        # p1 (VMEM-resident)
            pl.BlockSpec((HIDDEN, HIDDEN), lambda i: (0, 0)),   # w2 (VMEM-resident)
            pl.BlockSpec((HIDDEN, 8), lambda i: (0, 0)),        # p3 (VMEM-resident)
            pl.BlockSpec((INPUT_DIM, TB), lambda i: (0, i)),    # x tile
        ],
        out_specs=pl.BlockSpec((OUTPUT_DIM, TB), lambda i: (0, i)),
        out_shape=jax.ShapeDtypeStruct((OUTPUT_DIM, B_pad), jnp.float32),
        compiler_params=pltpu.CompilerParams(
            dimension_semantics=("parallel",),
            vmem_limit_bytes=32 * 1024 * 1024,
        ),
    )(p1, w2, p3, xt)

    return logp_t[:, :B].T   # (B, OUTPUT_DIM)


def init_params(key):
    """Deterministic synthetic params, PyTorch nn.Linear / nn.LayerNorm layouts."""
    ks = jax.random.split(key, 6)
    w1 = jax.random.normal(ks[0], (HIDDEN, INPUT_DIM), jnp.float32) * 0.5   # (out, in)
    b1 = jax.random.normal(ks[1], (HIDDEN,), jnp.float32) * 0.1
    g1 = jnp.ones((HIDDEN,), jnp.float32)
    be1 = jnp.zeros((HIDDEN,), jnp.float32)

    w2 = jax.random.normal(ks[2], (HIDDEN, HIDDEN), jnp.float32) * 0.2
    b2 = jax.random.normal(ks[3], (HIDDEN,), jnp.float32) * 0.1
    g2 = jnp.ones((HIDDEN,), jnp.float32)
    be2 = jnp.zeros((HIDDEN,), jnp.float32)

    w3 = jax.random.normal(ks[4], (OUTPUT_DIM, HIDDEN), jnp.float32) * 0.2
    b3 = jax.random.normal(ks[5], (OUTPUT_DIM,), jnp.float32) * 0.1
    return (w1, b1, g1, be1, w2, b2, g2, be2, w3, b3)


def _layernorm_ref(h, gamma, beta):
    mu = jnp.mean(h, axis=-1, keepdims=True)
    var = jnp.mean((h - mu) * (h - mu), axis=-1, keepdims=True)
    return (h - mu) * jax.lax.rsqrt(var + LN_EPS) * gamma + beta


def reference_forward(x, params):
    w1, b1, g1, be1, w2, b2, g2, be2, w3, b3 = params
    h = jnp.maximum(x @ w1.T + b1, 0.0)
    h = _layernorm_ref(h, g1, be1)
    h = jnp.maximum(h @ w2.T + b2, 0.0)
    h = _layernorm_ref(h, g2, be2)
    logits = h @ w3.T + b3
    return jax.nn.log_softmax(logits, axis=-1)


if __name__ == "__main__":
    key = jax.random.PRNGKey(0)
    kx, kx2, kp = jax.random.split(key, 3)
    params = init_params(kp)

    # Small primary check.
    B = 8
    x = jax.random.normal(kx, (B, INPUT_DIM), jnp.float32)
    logp = categorical_policy_forward(x, params)
    jax.block_until_ready(logp)
    ref_logp = reference_forward(x, params)
    assert logp.shape == (B, OUTPUT_DIM)
    assert jnp.allclose(logp, ref_logp, atol=1e-4, rtol=1e-4)

    # Non-128-aligned batch exercises the padding path.
    B2 = 200
    x2 = jax.random.normal(kx2, (B2, INPUT_DIM), jnp.float32)
    logp2 = categorical_policy_forward(x2, params)
    jax.block_until_ready(logp2)
    ref_logp2 = reference_forward(x2, params)
    assert logp2.shape == (B2, OUTPUT_DIM)
    assert jnp.allclose(logp2, ref_logp2, atol=1e-4, rtol=1e-4)

    # TODO(synk): Categorical .sample()/Gumbel reparameterization in get_action() is
    # stochastic host-side logic and is not part of the forward hot path.
    print("KERNEL_OK")
</pallas_src>

<mosaic_0001>
module attributes {stable_mosaic.version = 11 : i64} {
  func.func @policy_kernel(%arg0: i32, %arg1: memref<32x8xf32, #tpu.memory_space<vmem>>, %arg2: memref<32x32xf32, #tpu.memory_space<vmem>>, %arg3: memref<32x8xf32, #tpu.memory_space<vmem>>, %arg4: memref<2x128xf32, #tpu.memory_space<vmem>>, %arg5: memref<2x128xf32, #tpu.memory_space<vmem>>) attributes {dimension_semantics = [#tpu.dimension_semantics<parallel>], iteration_bounds = array<i64: 1>, scalar_prefetch = 0 : i64, scratch_operands = 0 : i64, tpu.core_type = #tpu.core_type<tc>, window_params = [{pipeline_mode = #tpu.pipeline_mode<synchronous>, transform_indices = @transform_0, window_bounds = array<i64: 32, 8>}, {pipeline_mode = #tpu.pipeline_mode<synchronous>, transform_indices = @transform_1, window_bounds = array<i64: 32, 32>}, {pipeline_mode = #tpu.pipeline_mode<synchronous>, transform_indices = @transform_2, window_bounds = array<i64: 32, 8>}, {transform_indices = @transform_3, window_bounds = array<i64: 2, 128>}, {transform_indices = @transform_4, window_bounds = array<i64: 2, 128>}]} {
    %c0 = arith.constant 0 : index
    %c0_0 = arith.constant 0 : index
    %0 = vector.load %arg4[%c0, %c0_0] : memref<2x128xf32, #tpu.memory_space<vmem>>, vector<2x128xf32>
    %c0_1 = arith.constant 0 : index
    %c0_2 = arith.constant 0 : index
    %1 = vector.load %arg1[%c0_1, %c0_2] : memref<32x8xf32, #tpu.memory_space<vmem>>, vector<32x8xf32>
    %c0_3 = arith.constant 0 : index
    %c0_4 = arith.constant 0 : index
    %2 = vector.load %arg3[%c0_3, %c0_4] : memref<32x8xf32, #tpu.memory_space<vmem>>, vector<32x8xf32>
    %3 = vector.extract_strided_slice %1 {offsets = [0, 0], sizes = [32, 1], strides = [1, 1]} : vector<32x8xf32> to vector<32x1xf32>
    %4 = vector.extract_strided_slice %0 {offsets = [0, 0], sizes = [1, 128], strides = [1, 1]} : vector<2x128xf32> to vector<1x128xf32>
    %5 = vector.broadcast %3 : vector<32x1xf32> to vector<32x128xf32>
    %6 = vector.broadcast %4 : vector<1x128xf32> to vector<32x128xf32>
    %7 = arith.mulf %5, %6 : vector<32x128xf32>
    %8 = vector.extract_strided_slice %1 {offsets = [0, 1], sizes = [32, 1], strides = [1, 1]} : vector<32x8xf32> to vector<32x1xf32>
    %9 = vector.extract_strided_slice %0 {offsets = [1, 0], sizes = [1, 128], strides = [1, 1]} : vector<2x128xf32> to vector<1x128xf32>
    %10 = vector.broadcast %8 : vector<32x1xf32> to vector<32x128xf32>
    %11 = vector.broadcast %9 : vector<1x128xf32> to vector<32x128xf32>
    %12 = arith.mulf %10, %11 : vector<32x128xf32>
    %13 = arith.addf %7, %12 : vector<32x128xf32>
    %14 = vector.extract_strided_slice %1 {offsets = [0, 2], sizes = [32, 1], strides = [1, 1]} : vector<32x8xf32> to vector<32x1xf32>
    %15 = vector.broadcast %14 : vector<32x1xf32> to vector<32x128xf32>
    %16 = arith.addf %13, %15 : vector<32x128xf32>
    %cst = arith.constant 0.000000e+00 : f32
    %17 = vector.broadcast %cst : f32 to vector<32x128xf32>
    %18 = arith.maximumf %16, %17 : vector<32x128xf32>
    %19 = vector.extract_strided_slice %1 {offsets = [0, 3], sizes = [32, 1], strides = [1, 1]} : vector<32x8xf32> to vector<32x1xf32>
    %20 = vector.extract_strided_slice %1 {offsets = [0, 4], sizes = [32, 1], strides = [1, 1]} : vector<32x8xf32> to vector<32x1xf32>
    %cst_5 = arith.constant dense<0.000000e+00> : vector<128xf32>
    %21 = vector.multi_reduction <add>, %18, %cst_5 [0] : vector<32x128xf32> to vector<128xf32>
    %22 = vector.shape_cast %21 : vector<128xf32> to vector<1x128xf32>
    %cst_6 = arith.constant 3.200000e+01 : f32
    %23 = vector.broadcast %cst_6 : f32 to vector<1x128xf32>
    %24 = arith.divf %22, %23 : vector<1x128xf32>
    %25 = vector.broadcast %24 : vector<1x128xf32> to vector<32x128xf32>
    %26 = arith.subf %18, %25 : vector<32x128xf32>
    %27 = arith.mulf %26, %26 : vector<32x128xf32>
    %cst_7 = arith.constant dense<0.000000e+00> : vector<128xf32>
    %28 = vector.multi_reduction <add>, %27, %cst_7 [0] : vector<32x128xf32> to vector<128xf32>
    %29 = vector.shape_cast %28 : vector<128xf32> to vector<1x128xf32>
    %cst_8 = arith.constant 3.200000e+01 : f32
    %30 = vector.broadcast %cst_8 : f32 to vector<1x128xf32>
    %31 = arith.divf %29, %30 : vector<1x128xf32>
    %cst_9 = arith.constant 9.99999974E-6 : f32
    %32 = vector.broadcast %cst_9 : f32 to vector<1x128xf32>
    %33 = arith.addf %31, %32 : vector<1x128xf32>
    %34 = math.rsqrt %33 : vector<1x128xf32>
    %35 = vector.broadcast %34 : vector<1x128xf32> to vector<32x128xf32>
    %36 = arith.mulf %26, %35 : vector<32x128xf32>
    %37 = vector.broadcast %19 : vector<32x1xf32> to vector<32x128xf32>
    %38 = arith.mulf %36, %37 : vector<32x128xf32>
    %39 = vector.broadcast %20 : vector<32x1xf32> to vector<32x128xf32>
    %40 = arith.addf %38, %39 : vector<32x128xf32>
    %c0_10 = arith.constant 0 : index
    %c0_11 = arith.constant 0 : index
    %41 = vector.load %arg2[%c0_10, %c0_11] : memref<32x32xf32, #tpu.memory_space<vmem>>, vector<32x32xf32>
    %cst_12 = arith.constant dense<0.000000e+00> : vector<32x128xf32>
    %42 = tpu.matmul %41, %40, %cst_12 {dimension_numbers = #tpu.dot_dimension_numbers<[1], [0], [0], [1], [0, 0, 1, 1], [], []>} : vector<32x32xf32>, vector<32x128xf32>, vector<32x128xf32> -> vector<32x128xf32>
    %43 = vector.extract_strided_slice %2 {offsets = [0, 0], sizes = [32, 1], strides = [1, 1]} : vector<32x8xf32> to vector<32x1xf32>
    %44 = vector.broadcast %43 : vector<32x1xf32> to vector<32x128xf32>
    %45 = arith.addf %42, %44 : vector<32x128xf32>
    %cst_13 = arith.constant 0.000000e+00 : f32
    %46 = vector.broadcast %cst_13 : f32 to vector<32x128xf32>
    %47 = arith.maximumf %45, %46 : vector<32x128xf32>
    %48 = vector.extract_strided_slice %2 {offsets = [0, 1], sizes = [32, 1], strides = [1, 1]} : vector<32x8xf32> to vector<32x1xf32>
    %49 = vector.extract_strided_slice %2 {offsets = [0, 2], sizes = [32, 1], strides = [1, 1]} : vector<32x8xf32> to vector<32x1xf32>
    %cst_14 = arith.constant dense<0.000000e+00> : vector<128xf32>
    %50 = vector.multi_reduction <add>, %47, %cst_14 [0] : vector<32x128xf32> to vector<128xf32>
    %51 = vector.shape_cast %50 : vector<128xf32> to vector<1x128xf32>
    %cst_15 = arith.constant 3.200000e+01 : f32
    %52 = vector.broadcast %cst_15 : f32 to vector<1x128xf32>
    %53 = arith.divf %51, %52 : vector<1x128xf32>
    %54 = vector.broadcast %53 : vector<1x128xf32> to vector<32x128xf32>
    %55 = arith.subf %47, %54 : vector<32x128xf32>
    %56 = arith.mulf %55, %55 : vector<32x128xf32>
    %cst_16 = arith.constant dense<0.000000e+00> : vector<128xf32>
    %57 = vector.multi_reduction <add>, %56, %cst_16 [0] : vector<32x128xf32> to vector<128xf32>
    %58 = vector.shape_cast %57 : vector<128xf32> to vector<1x128xf32>
    %cst_17 = arith.constant 3.200000e+01 : f32
    %59 = vector.broadcast %cst_17 : f32 to vector<1x128xf32>
    %60 = arith.divf %58, %59 : vector<1x128xf32>
    %cst_18 = arith.constant 9.99999974E-6 : f32
    %61 = vector.broadcast %cst_18 : f32 to vector<1x128xf32>
    %62 = arith.addf %60, %61 : vector<1x128xf32>
    %63 = math.rsqrt %62 : vector<1x128xf32>
    %64 = vector.broadcast %63 : vector<1x128xf32> to vector<32x128xf32>
    %65 = arith.mulf %55, %64 : vector<32x128xf32>
    %66 = vector.broadcast %48 : vector<32x1xf32> to vector<32x128xf32>
    %67 = arith.mulf %65, %66 : vector<32x128xf32>
    %68 = vector.broadcast %49 : vector<32x1xf32> to vector<32x128xf32>
    %69 = arith.addf %67, %68 : vector<32x128xf32>
    %70 = vector.extract_strided_slice %2 {offsets = [0, 3], sizes = [32, 1], strides = [1, 1]} : vector<32x8xf32> to vector<32x1xf32>
    %71 = vector.broadcast %70 : vector<32x1xf32> to vector<32x128xf32>
    %72 = arith.mulf %71, %69 : vector<32x128xf32>
    %cst_19 = arith.constant dense<0.000000e+00> : vector<128xf32>
    %73 = vector.multi_reduction <add>, %72, %cst_19 [0] : vector<32x128xf32> to vector<128xf32>
    %74 = vector.shape_cast %73 : vector<128xf32> to vector<1x128xf32>
    %75 = vector.extract_strided_slice %2 {offsets = [0, 5], sizes = [1, 1], strides = [1, 1]} : vector<32x8xf32> to vector<1x1xf32>
    %76 = vector.broadcast %75 : vector<1x1xf32> to vector<1x128xf32>
    %77 = arith.addf %74, %76 : vector<1x128xf32>
    %78 = vector.extract_strided_slice %2 {offsets = [0, 4], sizes = [32, 1], strides = [1, 1]} : vector<32x8xf32> to vector<32x1xf32>
    %79 = vector.broadcast %78 : vector<32x1xf32> to vector<32x128xf32>
    %80 = arith.mulf %79, %69 : vector<32x128xf32>
    %cst_20 = arith.constant dense<0.000000e+00> : vector<128xf32>
    %81 = vector.multi_reduction <add>, %80, %cst_20 [0] : vector<32x128xf32> to vector<128xf32>
    %82 = vector.shape_cast %81 : vector<128xf32> to vector<1x128xf32>
    %83 = vector.extract_strided_slice %2 {offsets = [1, 5], sizes = [1, 1], strides = [1, 1]} : vector<32x8xf32> to vector<1x1xf32>
    %84 = vector.broadcast %83 : vector<1x1xf32> to vector<1x128xf32>
    %85 = arith.addf %82, %84 : vector<1x128xf32>
    %86 = tpu.concatenate %77, %85 in 0 : vector<1x128xf32>, vector<1x128xf32> -> vector<2x128xf32>
    %cst_21 = arith.constant dense<0xFF800000> : vector<128xf32>
    %87 = vector.multi_reduction <maximumf>, %86, %cst_21 [0] : vector<2x128xf32> to vector<128xf32>
    %88 = vector.shape_cast %87 : vector<128xf32> to vector<1x128xf32>
    %89 = vector.broadcast %88 : vector<1x128xf32> to vector<2x128xf32>
    %90 = arith.subf %86, %89 : vector<2x128xf32>
    %91 = math.exp %90 : vector<2x128xf32>
    %cst_22 = arith.constant dense<0.000000e+00> : vector<128xf32>
    %92 = vector.multi_reduction <add>, %91, %cst_22 [0] : vector<2x128xf32> to vector<128xf32>
    %93 = vector.shape_cast %92 : vector<128xf32> to vector<1x128xf32>
    %94 = math.log %93 : vector<1x128xf32>
    %95 = arith.addf %88, %94 : vector<1x128xf32>
    %96 = vector.broadcast %95 : vector<1x128xf32> to vector<2x128xf32>
    %97 = arith.subf %86, %96 : vector<2x128xf32>
    %c0_23 = arith.constant 0 : index
    %c0_24 = arith.constant 0 : index
    %98 = vector.load %arg5[%c0_23, %c0_24] : memref<2x128xf32, #tpu.memory_space<vmem>>, vector<2x128xf32>
    tpu.vector_store %arg5[%c0_23, %c0_24], %97 {strides = array<i32>} : memref<2x128xf32, #tpu.memory_space<vmem>>, vector<2x128xf32>,
    return
  }
  func.func @transform_0(%arg0: i32) -> (i32, i32) {
    %c0_i32 = arith.constant 0 : i32
    %c0_i32_0 = arith.constant 0 : i32
    %c0_i32_1 = arith.constant 0 : i32
    return %c0_i32, %c0_i32_0 : i32, i32
  }
  func.func @transform_1(%arg0: i32) -> (i32, i32) {
    %c0_i32 = arith.constant 0 : i32
    %c0_i32_0 = arith.constant 0 : i32
    %c0_i32_1 = arith.constant 0 : i32
    return %c0_i32, %c0_i32_0 : i32, i32
  }
  func.func @transform_2(%arg0: i32) -> (i32, i32) {
    %c0_i32 = arith.constant 0 : i32
    %c0_i32_0 = arith.constant 0 : i32
    %c0_i32_1 = arith.constant 0 : i32
    return %c0_i32, %c0_i32_0 : i32, i32
  }
  func.func @transform_3(%arg0: i32) -> (i32, i32) {
    %c0_i32 = arith.constant 0 : i32
    %c0_i32_0 = arith.constant 0 : i32
    return %c0_i32, %arg0 : i32, i32
  }
  func.func @transform_4(%arg0: i32) -> (i32, i32) {
    %c0_i32 = arith.constant 0 : i32
    %c0_i32_0 = arith.constant 0 : i32
    return %c0_i32, %arg0 : i32, i32
  }
}

</mosaic_0001>

<bundles_post_ra>
// kernel: categorical_policy_forward.1
= control target key start
LH: loop header
LB: loop body
LE: loop exit
PB: predicated region body
PF: predicated region fallthrough
CT: control target
= control target key end

     0   :  { %v550_v0 = vmov 1   ;;  %v551_v1 = vmov 0   ;;  %v552_v6 = vmov 2   ;;  %v553_v7 = vmov 3   ;;  %s665_s0 = inlined_call_operand.vmem [shape: f32[32,8], index: 0, kind: input, shape index: {}]   ;;  %s666_s1 = inlined_call_operand.vmem [shape: f32[32,32], index: 1, kind: input, shape index: {}]   ;;  %s667_s2 = inlined_call_operand.vmem [shape: f32[32,8], index: 2, kind: input, shape index: {}]   ;;  %s668_s3 = inlined_call_operand.vmem [shape: f32[2,128], index: 3, kind: input, shape index: {}]   ;;  %s669_s4 = inlined_call_operand.vmem [shape: f32[2,128], index: 4, kind: output, shape index: {}]  }
   0x1   :  { %519 = vset.pattern.permute.xlu1 %v550_v0  ;;  %518 = vset.pattern.permute.xlu0 %v551_v1  ;;  %v18_v2 = vld [vmem:[%s665_s0] sm:$0xff]  ;;  %v19_v3 = vld [vmem:[%s665_s0 + $0x8] sm:$0xff]  ;;  %v20_v4 = vld [vmem:[%s665_s0 + $0x10] sm:$0xff]  ;;  %v554_v8 = vmov 4   ;;  %vm205_vm0 = vcmask 261120   ;;  %v46_v15 = vlaneseq  ;;  %v555_v58 = vmov 5  }
   0x2   :  { %55 = vperm.xlu1 %519, %v18_v2   ;;  %28 = vperm.xlu0 %518, %v18_v2   ;;  %v21_v5 = vld [vmem:[%s665_s0 + $0x18] sm:$0xff]  ;;  %v181_v9 = vld [vmem:[%s666_s1] sm:$0xff]  ;;  %v183_v10 = vld [vmem:[%s666_s1 + $0x10] sm:$0xff]  ;;  %vm445_vm1 = vcmask 1040384   ;;  %vm447_vm2 = vcmask 1041408  }
   0x3   :  { %494 = vmatprep.mubr.msk.f32.mxu0 %vm205_vm0, %v181_v9  ;;  %497 = vmatprep.mubr.msk.f32.mxu1 %vm205_vm0, %v183_v10  ;;  %v611_v11 = vld [vmem:[%s667_s2] sm:$0xff]  ;;  %v23_v12 = vld [vmem:[%s667_s2 + $0x8] sm:$0xff]  ;;  %v620_v13 = vld [vmem:[%s667_s2 + $0x10] sm:$0xff]  ;;  %v47_v16 = vshrl.u32 %v46_v15, 7 }
   0x4   :  { %v626_v14 = vld [vmem:[%s667_s2 + $0x18] sm:$0xff]  ;;  %v17_v21 = vld [vmem:[%s668_s3] sm:$0x3] }
   0x5   :  { %v72_v19 = vsub.s32 1, %v47_v16  ;;  %v48_v20 = vsub.s32 0, %v47_v16 }
   0x6   :  { %59 = vperm.xlu1 %519, %v19_v3   ;;  %33 = vperm.xlu0 %518, %v19_v3  }
   0x7   :  { %v73_v24 = vrot.slane %v17_v21, %v72_v19  ;;  %v49_v25 = vrot.slane %v17_v21, %v48_v20 }
   0xa   :  { %63 = vperm.xlu1 %519, %v20_v4   ;;  %38 = vperm.xlu0 %518, %v20_v4  }
   0xe   :  { %67 = vperm.xlu1 %519, %v21_v5   ;;  %43 = vperm.xlu0 %518, %v21_v5  }
  0x12   :  { %521 = vset.pattern.permute.xlu1 %v552_v6  ;;  %520 = vset.pattern.permute.xlu0 %v552_v6 }
  0x13   :  { %87 = vperm.xlu1 %521, %v19_v3   ;;  %83 = vperm.xlu0 %520, %v18_v2  }
  0x17   :  { %91 = vperm.xlu1 %521, %v20_v4   ;;  %95 = vperm.xlu0 %520, %v21_v5  }
  0x1b   :  { %522 = vset.pattern.permute.xlu1 %v553_v7  ;;  %523 = vset.pattern.permute.xlu0 %v553_v7 }
  0x1c   :  { %142 = vperm.xlu1 %522, %v18_v2   ;;  %146 = vperm.xlu0 %523, %v19_v3  }
  0x20   :  { %524 = vset.pattern.permute.xlu1 %v554_v8  ;;  %150 = vperm.xlu0 %523, %v20_v4  }
  0x21   :  { %162 = vperm.xlu1 %524, %v18_v2  }
  0x24   :  { %526 = vset.pattern.permute.xlu0 %v554_v8 }
  0x25   :  { %166 = vperm.xlu1 %524, %v19_v3   ;;  %170 = vperm.xlu0 %526, %v20_v4  }
  0x29   :  { %525 = vset.pattern.permute.xlu1 %v553_v7  ;;  %529 = vset.pattern.permute.xlu0 %v551_v1 }
  0x2a   :  { %154 = vperm.xlu1 %525, %v21_v5   ;;  %192 = vperm.xlu0 %529, %v23_v12  }
  0x2e   :  { %527 = vset.pattern.permute.xlu1 %v554_v8  ;;  %530 = vset.pattern.permute.xlu0 %v550_v0 }
  0x2f   :  { %174 = vperm.xlu1 %527, %v21_v5   ;;  %342 = vperm.xlu0 %530, %v611_v11  }
  0x33   :  { %528 = vset.pattern.permute.xlu1 %v551_v1  ;;  %532 = vset.pattern.permute.xlu0 %v552_v6 }
  0x34   :  { %187 = vperm.xlu1 %528, %v611_v11   ;;  %362 = vperm.xlu0 %532, %v611_v11  }
  0x38   :  { %197 = vperm.xlu1 %528, %v620_v13   ;;  %370 = vperm.xlu0 %532, %v620_v13  }
  0x3c   :  { %202 = vperm.xlu1 %528, %v626_v14   ;;  %374 = vperm.xlu0 %532, %v626_v14  }
  0x40   :  { %531 = vset.pattern.permute.xlu1 %v550_v0  ;;  %537 = vset.pattern.permute.xlu0 %v553_v7 }
  0x41   :  { %346 = vperm.xlu1 %531, %v23_v12   ;;  %386 = vperm.xlu0 %537, %v23_v12  }
  0x45   :  { %350 = vperm.xlu1 %531, %v620_v13   ;;  %394 = vperm.xlu0 %537, %v626_v14  }
  0x49   :  { %533 = vset.pattern.permute.xlu1 %v552_v6  ;;  %541 = vset.pattern.permute.xlu0 %v554_v8 }
  0x4a   :  { %366 = vperm.xlu1 %533, %v23_v12  }
  0x4e   :  { %534 = vset.pattern.permute.xlu1 %v550_v0 }
  0x4f   :  { %354 = vperm.xlu1 %534, %v626_v14  }
  0x53   :  { %535 = vset.pattern.permute.xlu1 %v553_v7 }
  0x54   :  { %382 = vperm.xlu1 %535, %v611_v11  }
  0x58   :  { %536 = vset.pattern.permute.xlu1 %v554_v8 }
  0x59   :  { %416 = vperm.xlu1 %536, %v611_v11  }
  0x5d   :  { %420 = vperm.xlu1 %536, %v23_v12  }
  0x61   :  { %538 = vset.pattern.permute.xlu1 %v553_v7 }
  0x62   :  { %390 = vperm.xlu1 %538, %v620_v13  }
  0x66   :  { %539 = vset.pattern.permute.xlu1 %v554_v8 }
  0x67   :  { %424 = vperm.xlu1 %539, %v620_v13  }
  0x6b   :  { %428 = vperm.xlu1 %539, %v626_v14  }
  0x6f   :  { %540 = vset.pattern.permute.xlu1 %v555_v58 }
  0x70   :  { %411 = vperm.xlu1 %540, %v611_v11  }
  0x81   :  { %v56_v17 = vpop.permute.xlu1 %55  ;;  %v29_v18 = vpop.permute.xlu0 %28 }
  0x82   :  { %v74_v28 = vmul.f32 %v73_v24, %v56_v17  ;;  %v50_v29 = vmul.f32 %v49_v25, %v29_v18 }
  0x84   :  { %v78_v35 = vadd.f32 %v74_v28, %v50_v29 }
  0x85   :  { %v60_v22 = vpop.permute.xlu1 %59  ;;  %v34_v23 = vpop.permute.xlu0 %33 }
  0x86   :  { %v75_v30 = vmul.f32 %v73_v24, %v60_v22  ;;  %v51_v31 = vmul.f32 %v49_v25, %v34_v23 }
  0x88   :  { %v79_v34 = vadd.f32 %v75_v30, %v51_v31 }
  0x89   :  { %v64_v26 = vpop.permute.xlu1 %63  ;;  %v39_v27 = vpop.permute.xlu0 %38 }
  0x8a   :  { %v76_v36 = vmul.f32 %v73_v24, %v64_v26  ;;  %v52_v37 = vmul.f32 %v49_v25, %v39_v27 }
  0x8c   :  { %v80_v46 = vadd.f32 %v76_v36, %v52_v37 }
  0x8d   :  { %v68_v32 = vpop.permute.xlu1 %67  ;;  %v44_v33 = vpop.permute.xlu0 %43 }
  0x8e   :  { %v77_v38 = vmul.f32 %v73_v24, %v68_v32  ;;  %v53_v39 = vmul.f32 %v49_v25, %v44_v33 }
  0x90   :  { %v81_v47 = vadd.f32 %v77_v38, %v53_v39 }
  0x92   :  { %v88_v40 = vpop.permute.xlu1 %87  ;;  %v84_v41 = vpop.permute.xlu0 %83 }
  0x93   :  { %v99_v42 = vadd.f32 %v88_v40, %v79_v34  ;;  %v98_v43 = vadd.f32 %v84_v41, %v78_v35 }
  0x95   :  { %v103_v44 = vmax.f32 %v99_v42, 0.0  ;;  %v102_v45 = vmax.f32 %v98_v43, 0.0  ;;  %v182_v43 = vld [vmem:[%s666_s1 + $0x8] sm:$0xff] }
  0x96   :  { %v92_v48 = vpop.permute.xlu1 %91  ;;  %v96_v49 = vpop.permute.xlu0 %95 }
  0x97   :  { %v100_v50 = vadd.f32 %v92_v48, %v80_v46  ;;  %v101_v51 = vadd.f32 %v96_v49, %v81_v47  ;;  %v106_v52 = vadd.f32 %v103_v44, %v102_v45 }
  0x99   :  { %v104_v53 = vmax.f32 %v100_v50, 0.0  ;;  %v105_v55 = vmax.f32 %v101_v51, 0.0 }
  0x9b   :  { %v107_v54 = vadd.f32 %v106_v52, %v104_v53  ;;  %v143_v15 = vpop.permute.xlu1 %142  ;;  %v147_v22 = vpop.permute.xlu0 %146 }
  0x9d   :  { %v108_v56 = vadd.f32 %v107_v54, %v105_v55 }
  0x9f   :  { %v109_v57 = vrot.slane %v108_v56, 4  ;;  %v151_v24 = vpop.permute.xlu0 %150 }
  0xa0   :  { %v163_v20 = vpop.permute.xlu1 %162 }
  0xa1   :  { %v110_v59 = vadd.f32 %v109_v57, %v108_v56 }
  0xa3   :  { %v111_v60 = vrot.slane %v110_v59, 2 }
  0xa4   :  { %v167_v23 = vpop.permute.xlu1 %166  ;;  %v171_v32 = vpop.permute.xlu0 %170 }
  0xa5   :  { %v112_v61 = vadd.f32 %v111_v60, %v110_v59 }
  0xa7   :  { %v113_v62 = vrot.slane %v112_v61, 1 }
  0xa9   :  { %v114_v63 = vadd.f32 %v113_v62, %v112_v61  ;;  %v155_v25 = vpop.permute.xlu1 %154  ;;  %v193_v47 = vpop.permute.xlu0 %192 }
  0xab   :  { %v116_v0 = vmul.f32 0.03125, %v114_v63 }
  0xad   :  { %v117_v1 = vsub.f32 %v102_v45, %v116_v0  ;;  %v118_v2 = vsub.f32 %v103_v44, %v116_v0  ;;  %v119_v3 = vsub.f32 %v104_v53, %v116_v0  ;;  %v120_v4 = vsub.f32 %v105_v55, %v116_v0  ;;  %v184_v44 = vld [vmem:[%s666_s1 + $0x18] sm:$0xff] }
  0xae   :  { %v175_v31 = vpop.permute.xlu1 %174 }
  0xaf   :  { %v121_v5 = vmul.f32 %v117_v1, %v117_v1  ;;  %v122_v6 = vmul.f32 %v118_v2, %v118_v2  ;;  %v123_v7 = vmul.f32 %v119_v3, %v119_v3  ;;  %v124_v9 = vmul.f32 %v120_v4, %v120_v4 }
  0xb1   :  { %v125_v8 = vadd.f32 %v122_v6, %v121_v5 }
  0xb3   :  { %v126_v10 = vadd.f32 %v125_v8, %v123_v7  ;;  %v188_v45 = vpop.permute.xlu1 %187 }
  0xb5   :  { %v127_v12 = vadd.f32 %v126_v10, %v124_v9 }
  0xb7   :  { %v128_v13 = vrot.slane %v127_v12, 4  ;;  %v198_v46 = vpop.permute.xlu1 %197 }
  0xb9   :  { %v129_v14 = vadd.f32 %v128_v13, %v127_v12 }
  0xbb   :  { %v130_v11 = vrot.slane %v129_v14, 2  ;;  %v203_v55 = vpop.permute.xlu1 %202 }
  0xbd   :  { %v131_v16 = vadd.f32 %v130_v11, %v129_v14 }
  0xbf   :  { %v132_v17 = vrot.slane %v131_v16, 1 }
  0xc0   :  { %v347_v5 = vpop.permute.xlu1 %346 }
  0xc1   :  { %v133_v18 = vadd.f32 %v132_v17, %v131_v16 }
  0xc3   :  { %v134_v19 = vmul.f32 0.03125, %v133_v18 }
  0xc4   :  { %v351_v13 = vpop.permute.xlu1 %350 }
  0xc5   :  { %v135_v21 = vadd.f32 1e-05, %v134_v19 }
  0xc7   :  { %542 = vrsqrt.f32 %v135_v21 }
  0xc9   :  { %v367_v17 = vpop.permute.xlu1 %366 }
  0xd1   :  { %v543_v26 = vpop.eup %542 }
  0xd2   :  { %v137_v27 = vmul.f32 %v543_v26, %v117_v1  ;;  %v138_v28 = vmul.f32 %v543_v26, %v118_v2  ;;  %v139_v29 = vmul.f32 %v543_v26, %v119_v3  ;;  %v140_v30 = vmul.f32 %v543_v26, %v120_v4 }
  0xd4   :  { %v157_v33 = vmul.f32 %v143_v15, %v137_v27  ;;  %v158_v34 = vmul.f32 %v147_v22, %v138_v28  ;;  %v159_v35 = vmul.f32 %v151_v24, %v139_v29  ;;  %v160_v36 = vmul.f32 %v155_v25, %v140_v30  ;;  %v355_v22 = vpop.permute.xlu1 %354  ;;  %v343_v27 = vpop.permute.xlu0 %342 }
  0xd6   :  { %v177_v37 = vadd.f32 %v163_v20, %v157_v33  ;;  %v178_v38 = vadd.f32 %v167_v23, %v158_v34  ;;  %v180_v39 = vadd.f32 %v175_v31, %v160_v36  ;;  %v179_v40 = vadd.f32 %v171_v32, %v159_v35 }
  0xd8   :  { %v500_v41 = vpack.c.bf16 %v178_v38, %v177_v37  ;;  %v504_v42 = vpack.c.bf16 %v180_v39, %v179_v40  ;;  %v383_v26 = vpop.permute.xlu1 %382  ;;  %v363_v32 = vpop.permute.xlu0 %362 }
  0xda   :  { %501 = vmatprep.subr.bf16.mxu0 %v500_v41  ;;  %508 = vmatprep.subr.bf16.mxu1 %v500_v41 }
  0xdb   :  { %503 = vmatpush3.bf16.msra.mxu0 %v500_v41  ;;  %510 = vmatpush3.bf16.msra.mxu1 %v500_v41 }
  0xdc   :  { %505 = vmatprep.subr.bf16.mxu0 %v504_v42  ;;  %509 = vmatprep.subr.bf16.mxu1 %v504_v42  ;;  %v417_v31 = vpop.permute.xlu1 %416  ;;  %v371_v35 = vpop.permute.xlu0 %370 }
  0xdf   :  { %507 = vmatpush3.bf16.msra.mxu0 %v504_v42  ;;  %511 = vmatpush3.bf16.msra.mxu1 %v504_v42 }
  0xe0   :  { %v421_v34 = vpop.permute.xlu1 %420  ;;  %v375_v37 = vpop.permute.xlu0 %374 }
  0xe2   :  { %495 = vmatmul.mubr.msk.f32.vlgmr.msra.gmra.mrb[0].mxu0 %vm205_vm0, %v182_v43  ;;  %498 = vmatmul.mubr.msk.f32.vlgmr.msra.gmra.mrb[0].mxu1 %vm205_vm0, %v184_v44 }
  0xe4   :  { %v391_v36 = vpop.permute.xlu1 %390 }
  0xe8   :  { %v425_v43 = vpop.permute.xlu1 %424 }
 0x1b5   :  { %v496_v48 = vpop.f32.mrb[0].mxu0  ;;  %v499_v49 = vpop.f32.mrb[0].mxu1 }
 0x1b6   :  { %v290_v50 = vadd.f32 %v496_v48, %v193_v47  ;;  %v284_v51 = vpop.f32.mrb[1].mxu0  ;;  %v294_v52 = vpop.f32.mrb[1].mxu1  ;;  %v300_v57 = vadd.f32 %v499_v49, %v203_v55 }
 0x1b7   :  { %v285_v53 = vadd.f32 %v284_v51, %v188_v45  ;;  %v295_v54 = vadd.f32 %v294_v52, %v198_v46  ;;  %v387_v48 = vpop.permute.xlu0 %386 }
 0x1b8   :  { %v304_v56 = vmax.f32 %v290_v50, 0.0  ;;  %v306_v61 = vmax.f32 %v300_v57, 0.0  ;;  %v429_v57 = vpop.permute.xlu1 %428 }
 0x1b9   :  { %v303_v58 = vmax.f32 %v285_v53, 0.0  ;;  %v305_v60 = vmax.f32 %v295_v54, 0.0 }
 0x1bb   :  { %v307_v59 = vadd.f32 %v304_v56, %v303_v58 }
 0x1bd   :  { %v308_v62 = vadd.f32 %v307_v59, %v305_v60 }
 0x1bf   :  { %v309_v63 = vadd.f32 %v308_v62, %v306_v61 }
 0x1c1   :  { %v310_v0 = vrot.slane %v309_v63, 4 }
 0x1c3   :  { %v311_v1 = vadd.f32 %v310_v0, %v309_v63 }
 0x1c5   :  { %v312_v2 = vrot.slane %v311_v1, 2 }
 0x1c7   :  { %v313_v3 = vadd.f32 %v312_v2, %v311_v1 }
 0x1c9   :  { %v314_v4 = vrot.slane %v313_v3, 1 }
 0x1cb   :  { %v315_v6 = vadd.f32 %v314_v4, %v313_v3 }
 0x1cd   :  { %v316_v7 = vmul.f32 0.03125, %v315_v6 }
 0x1cf   :  { %v319_v8 = vsub.f32 %v305_v60, %v316_v7  ;;  %v320_v9 = vsub.f32 %v306_v61, %v316_v7  ;;  %v317_v10 = vsub.f32 %v303_v58, %v316_v7  ;;  %v318_v12 = vsub.f32 %v304_v56, %v316_v7  ;;  %v395_v60 = vpop.permute.xlu0 %394 }
 0x1d1   :  { %v321_v14 = vmul.f32 %v317_v10, %v317_v10  ;;  %v322_v11 = vmul.f32 %v318_v12, %v318_v12  ;;  %v323_v15 = vmul.f32 %v319_v8, %v319_v8  ;;  %v324_v18 = vmul.f32 %v320_v9, %v320_v9 }
 0x1d3   :  { %v325_v16 = vadd.f32 %v322_v11, %v321_v14  ;;  %v412_v11 = vpop.permute.xlu1 %411 }
 0x1d5   :  { %v326_v19 = vadd.f32 %v325_v16, %v323_v15 }
 0x1d7   :  { %v327_v20 = vadd.f32 %v326_v19, %v324_v18 }
 0x1d9   :  { %v328_v21 = vrot.slane %v327_v20, 4 }
 0x1db   :  { %v329_v23 = vadd.f32 %v328_v21, %v327_v20 }
 0x1dd   :  { %v330_v24 = vrot.slane %v329_v23, 2 }
 0x1df   :  { %v331_v25 = vadd.f32 %v330_v24, %v329_v23 }
 0x1e1   :  { %v332_v28 = vrot.slane %v331_v25, 1 }
 0x1e3   :  { %v333_v29 = vadd.f32 %v332_v28, %v331_v25 }
 0x1e5   :  { %v334_v30 = vmul.f32 0.03125, %v333_v29 }
 0x1e7   :  { %v335_v33 = vadd.f32 1e-05, %v334_v30 }
 0x1e9   :  { %544 = vrsqrt.f32 %v335_v33 }
 0x1f3   :  { %v545_v38 = vpop.eup %544 }
 0x1f4   :  { %v338_v39 = vmul.f32 %v545_v38, %v318_v12  ;;  %v339_v40 = vmul.f32 %v545_v38, %v319_v8  ;;  %v340_v41 = vmul.f32 %v545_v38, %v320_v9  ;;  %v337_v42 = vmul.f32 %v545_v38, %v317_v10 }
 0x1f6   :  { %v358_v44 = vmul.f32 %v347_v5, %v338_v39  ;;  %v359_v45 = vmul.f32 %v351_v13, %v339_v40  ;;  %v360_v46 = vmul.f32 %v355_v22, %v340_v41  ;;  %v357_v47 = vmul.f32 %v343_v27, %v337_v42 }
 0x1f8   :  { %v378_v49 = vadd.f32 %v367_v17, %v358_v44  ;;  %v377_v50 = vadd.f32 %v363_v32, %v357_v47  ;;  %v379_v51 = vadd.f32 %v371_v35, %v359_v45  ;;  %v380_v55 = vadd.f32 %v375_v37, %v360_v46 }
 0x1fa   :  { %v397_v52 = vmul.f32 %v383_v26, %v377_v50  ;;  %v431_v53 = vmul.f32 %v417_v31, %v377_v50  ;;  %v432_v54 = vmul.f32 %v421_v34, %v378_v49  ;;  %v398_v56 = vmul.f32 %v387_v48, %v378_v49 }
 0x1fb   :  { %v433_v59 = vmul.f32 %v425_v43, %v379_v51  ;;  %v399_v61 = vmul.f32 %v391_v36, %v379_v51  ;;  %v434_v0 = vmul.f32 %v429_v57, %v380_v55  ;;  %v400_v2 = vmul.f32 %v395_v60, %v380_v55 }
 0x1fc   :  { %v435_v58 = vadd.f32 %v432_v54, %v431_v53  ;;  %v401_v62 = vadd.f32 %v398_v56, %v397_v52 }
 0x1fe   :  { %v436_v63 = vadd.f32 %v435_v58, %v433_v59  ;;  %v402_v1 = vadd.f32 %v401_v62, %v399_v61 }
 0x200   :  { %v437_v3 = vadd.f32 %v436_v63, %v434_v0  ;;  %v403_v4 = vadd.f32 %v402_v1, %v400_v2 }
 0x202   :  { %v438_v5 = vrot.slane %v437_v3, 4  ;;  %v404_v6 = vrot.slane %v403_v4, 4 }
 0x204   :  { %v439_v7 = vadd.f32 %v438_v5, %v437_v3  ;;  %v405_v8 = vadd.f32 %v404_v6, %v403_v4 }
 0x206   :  { %v440_v9 = vrot.slane %v439_v7, 2  ;;  %v406_v10 = vrot.slane %v405_v8, 2 }
 0x208   :  { %v441_v12 = vadd.f32 %v440_v9, %v439_v7  ;;  %v407_v13 = vadd.f32 %v406_v10, %v405_v8 }
 0x20a   :  { %v442_v14 = vrot.slane %v441_v12, 1  ;;  %v408_v15 = vrot.slane %v407_v13, 1 }
 0x20c   :  { %v443_v16 = vadd.f32 %v442_v14, %v441_v12  ;;  %v409_v17 = vadd.f32 %v408_v15, %v407_v13 }
 0x20e   :  { %v444_v18 = vadd.f32 %v443_v16, %v412_v11  ;;  %v414_v19 = vadd.f32 %v412_v11, %v409_v17 }
 0x210   :  { %v446_v20 = vsel %vm445_vm1, %v414_v19, %v444_v18 }
 0x211   :  { %v448_v21 = vsel %vm447_vm2, %v446_v20, -inf }
 0x212   :  { %v449_v22 = vrot.slane %v448_v21, 4 }
 0x214   :  { %v450_v23 = vmax.f32 %v448_v21, %v449_v22 }
 0x216   :  { %v451_v24 = vrot.slane %v450_v23, 2 }
 0x218   :  { %v452_v25 = vmax.f32 %v450_v23, %v451_v24 }
 0x21a   :  { %v453_v26 = vrot.slane %v452_v25, 1 }
 0x21c   :  { %v454_v27 = vmax.f32 %v452_v25, %v453_v26 }
 0x21e   :  { %v455_v28 = vsub.f32 %v446_v20, %v454_v27 }
 0x220   :  { %v456_v29 = vmul.f32 1.442695, %v455_v28 }
 0x222   :  { %546 = vpow2.f32 %v456_v29 }
 0x22c   :  { %v547_v30 = vpop.eup %546 }
 0x22d   :  { %v458_v31 = vsel %vm447_vm2, %v547_v30, 0.0 }
 0x22e   :  { %v459_v32 = vrot.slane %v458_v31, 4 }
 0x230   :  { %v460_v33 = vadd.f32 %v459_v32, %v458_v31 }
 0x232   :  { %v461_v34 = vrot.slane %v460_v33, 2 }
 0x234   :  { %v462_v35 = vadd.f32 %v461_v34, %v460_v33 }
 0x236   :  { %v463_v36 = vrot.slane %v462_v35, 1 }
 0x238   :  { %v464_v37 = vadd.f32 %v463_v36, %v462_v35 }
 0x23a   :  { %548 = vlog2.f32 %v464_v37 }
 0x244   :  { %v549_v38 = vpop.eup %548 }
 0x245   :  { %v466_v39 = vmul.f32 0.6931472, %v549_v38 }
 0x247   :  { %v467_v40 = vadd.f32 %v466_v39, %v454_v27 }
 0x249   :  { %v468_v41 = vsub.f32 %v446_v20, %v467_v40 }
 0x24b   :  { %469 = vst [vmem:[%s669_s4] sm:$0x3] %v468_v41 }

</bundles_post_ra>
